<compile_context>
chip_gen: v7x
topology: tpu7x:2x2x1
jax: 0.10.0
libtpu: 0.0.40
codegen_flags: <defaults>
</compile_context>

<pallas_src>
import jax
import jax.numpy as jnp
from jax.experimental import pallas as pl
from jax.experimental.pallas import tpu as pltpu

LANE = 128          # lane width; padded output-feature width of every projection
MAX_BLOCK_B = 512   # batch-tile cap (per-step live VMEM ~10 MiB << v7x's 64 MiB)


def _round_up(x, m):
    return ((x + m - 1) // m) * m


def _silu(z):
    return z * jax.nn.sigmoid(z)


# ---------------------------------------------------------------------------
# Kernel: one grid step processes `block_b` batch elements (folded into the
# matmul M dimension as block_b * N rows).
# ---------------------------------------------------------------------------
def self_attention_kernel(comb_ref, w1_ref, w23_ref, b_ref, out_ref):
    """comb_ref: (Bt*N, D)  bf16 -- unpadded combined features.
       w1_ref:   (D, 2*Dp)  bf16 -- [attention | value], out cols zero-padded to 128 each.
       w23_ref:  (Dp, 2*Hp) bf16 -- [out_scalar[0]|out_vector[0] | blockdiag(out_scalar[2], out_vector[2])].
       b_ref:    (8, 2*Dp)  f32  -- row0=[ba|bv], row1=[bs1|bq1], row2=[bs2|bq2] (zero-padded).
       out_ref:  (Bt, Hp)   f32  -- [scalar_out | vector_out | 0...]."""
    Bt, Hp = out_ref.shape
    M, D = comb_ref.shape
    N = M // Bt
    Dp = w1_ref.shape[1] // 2

    x = comb_ref[...]                                     # (Bt*N, D) bf16

    # Two separate lane-aligned 128-wide projections (no fused 256-wide `sv`
    # intermediate, no lane-slicing of a wide result).
    scores = (jnp.dot(x, w1_ref[:, 0:Dp], preferred_element_type=jnp.float32)
              + b_ref[0:1, 0:Dp]).reshape(Bt, N, Dp)
    vals = (jnp.dot(x, w1_ref[:, Dp:2 * Dp], preferred_element_type=jnp.float32)
            + b_ref[0:1, Dp:2 * Dp]).reshape(Bt, N, Dp)

    # Softmax over the set axis N (per feature column); exact denominator --
    # the approx EUP reciprocal bought nothing here (exp already owns that slot).
    m = jnp.max(scores, axis=1, keepdims=True)
    e = jnp.exp(scores - m)
    denom = jnp.sum(e, axis=1)                            # (Bt, Dp)
    attended = jnp.sum(e * vals, axis=1) / denom          # (Bt, Dp) f32
    # Padded columns: scores==0 -> e==1, vals==0 -> attended==0 exactly.

    # First output layers (output_scalar[0] | output_vector[0]) + SiLU.
    h = jnp.dot(attended.astype(w23_ref.dtype), w23_ref[:, 0:Hp],
                preferred_element_type=jnp.float32) + b_ref[1:2, 0:Hp]
    h = _silu(h)

    # Second output layers: block-diag(output_scalar[2], output_vector[2]).
    out_ref[...] = (jnp.dot(h.astype(w23_ref.dtype), w23_ref[:, Hp:2 * Hp],
                            preferred_element_type=jnp.float32)
                    + b_ref[2:3, 0:Hp])


# ---------------------------------------------------------------------------
# Parameters (logical, unpadded, stored pre-transposed as (in, out)).
# ---------------------------------------------------------------------------
def init_params(key, scalar_dim, vector_dim):
    D = scalar_dim + 3 * vector_dim
    S = scalar_dim
    V3 = 3 * vector_dim
    ks = jax.random.split(key, 12)

    def w(k, fan_in, fan_out):
        return jax.random.normal(k, (fan_in, fan_out), jnp.float32) / jnp.sqrt(fan_in)

    def b(k, fan_out):
        return jax.random.normal(k, (1, fan_out), jnp.float32) * 0.05

    return dict(
        wa=w(ks[0], D, D), ba=b(ks[1], D),
        wv=w(ks[2], D, D), bv=b(ks[3], D),
        ws1=w(ks[4], D, S), bs1=b(ks[5], S),
        ws2=w(ks[6], S, S), bs2=b(ks[7], S),
        wq1=w(ks[8], D, V3), bq1=b(ks[9], V3),
        wq2=w(ks[10], V3, V3), bq2=b(ks[11], V3),
    )


def pack_params(params, scalar_dim, vector_dim, compute_dtype=jnp.bfloat16):
    """Fuse weights into two slabs and biases into one slab.
    Invariant: every padded entry is EXACTLY zero (slabs start from zeros and
    only the valid sub-blocks are written), so padded lanes never leak into
    the valid outputs."""
    S = scalar_dim
    V3 = 3 * vector_dim
    D = S + V3
    Dp = Hp = LANE
    assert D <= Dp, "feature dims must fit within one 128-lane tile"

    # First matmul slab, UNPADDED K: (D, 2*Dp) = [attention | value].
    w1 = jnp.zeros((D, 2 * Dp), jnp.float32)
    w1 = w1.at[:, :D].set(params["wa"]).at[:, Dp:Dp + D].set(params["wv"])

    # Later matmuls slab: (Dp, 2*Hp).
    #   cols [0:Hp)      = [output_scalar[0] | output_vector[0]]
    #   cols [Hp:2*Hp)   = block-diag(output_scalar[2], output_vector[2])
    w23 = jnp.zeros((Dp, 2 * Hp), jnp.float32)
    w23 = w23.at[:D, :S].set(params["ws1"]).at[:D, S:S + V3].set(params["wq1"])
    w23 = w23.at[:S, Hp:Hp + S].set(params["ws2"])
    w23 = w23.at[S:D, Hp + S:Hp + D].set(params["wq2"])

    # Biases (kept in f32; tiny).
    b = jnp.zeros((8, 2 * Dp), jnp.float32)
    b = b.at[0, :D].set(params["ba"][0]).at[0, Dp:Dp + D].set(params["bv"][0])
    b = b.at[1, :S].set(params["bs1"][0]).at[1, S:S + V3].set(params["bq1"][0])
    b = b.at[2, :S].set(params["bs2"][0]).at[2, S:S + V3].set(params["bq2"][0])

    return w1.astype(compute_dtype), w23.astype(compute_dtype), b


# ---------------------------------------------------------------------------
# Forward wrapper.
# ---------------------------------------------------------------------------
def self_attention_forward(scalar, vector, w1_slab, w23_slab, b_slab):
    """scalar: (B, N, S) f32, vector: (B, N, V, 3) f32
    returns (scalar_out (B, S), vector_out (B, V, 3))."""
    B, N, S = scalar.shape
    V = vector.shape[2]
    V3 = 3 * V
    D = S + V3
    Dp = Hp = LANE

    # Combined features, bf16, UNPADDED along the feature axis: only D lanes
    # travel over HBM (vs. 128 previously) and no padded HBM temp is created.
    combined = jnp.concatenate(
        [scalar, vector.reshape(B, N, V3)], axis=-1).astype(jnp.bfloat16)

    # Fixed-size batch tile: multiple of 8, capped so per-step live VMEM stays
    # ~10 MiB (fits v7x's 64 MiB with double-buffer headroom); batch is padded
    # to a tile multiple so every grid step is full and the grid can pipeline.
    block_b = min(_round_up(B, 8), MAX_BLOCK_B)
    b_pad = _round_up(B, block_b)
    if b_pad != B:
        combined = jnp.pad(combined, ((0, b_pad - B), (0, 0), (0, 0)))
    combined = combined.reshape(b_pad * N, D)   # fold batch into the matmul M dim
    grid = (b_pad // block_b,)

    flops = 2 * b_pad * N * D * (2 * Dp) + 2 * b_pad * Dp * (2 * Hp)
    transcendentals = b_pad * N * Dp + b_pad * Hp
    bytes_accessed = (combined.size * 2 + w1_slab.size * 2 + w23_slab.size * 2
                      + b_slab.size * 4 + b_pad * Hp * 4)

    out = pl.pallas_call(
        self_attention_kernel,
        out_shape=jax.ShapeDtypeStruct((b_pad, Hp), jnp.float32),
        grid=grid,
        in_specs=[
            pl.BlockSpec((block_b * N, D), lambda i: (i, 0)),
            pl.BlockSpec((D, 2 * Dp), lambda i: (0, 0)),
            pl.BlockSpec((Dp, 2 * Hp), lambda i: (0, 0)),
            pl.BlockSpec((8, 2 * Dp), lambda i: (0, 0)),
        ],
        out_specs=pl.BlockSpec((block_b, Hp), lambda i: (i, 0)),
        compiler_params=pltpu.CompilerParams(
            dimension_semantics=("parallel",),
            vmem_limit_bytes=32 * 1024 * 1024),
        cost_estimate=pl.CostEstimate(flops=flops,
                                      transcendentals=transcendentals,
                                      bytes_accessed=bytes_accessed),
    )(combined, w1_slab, w23_slab, b_slab)

    scalar_out = out[:B, :S]
    vector_out = out[:B, S:S + V3].reshape(B, V, 3)
    return scalar_out, vector_out


# ---------------------------------------------------------------------------
# Pure-JAX reference mirroring the PyTorch forward exactly (f32, unpadded).
# ---------------------------------------------------------------------------
def reference_forward(scalar, vector, params):
    B, N, S = scalar.shape
    V = vector.shape[2]
    p = params
    combined = jnp.concatenate([scalar, vector.reshape(B, N, 3 * V)], axis=-1)
    scores = combined @ p["wa"] + p["ba"]
    weights = jax.nn.softmax(scores, axis=1)
    values = combined @ p["wv"] + p["bv"]
    attended = jnp.sum(weights * values, axis=1)
    hs = _silu(attended @ p["ws1"] + p["bs1"])
    scalar_out = hs @ p["ws2"] + p["bs2"]
    hv = _silu(attended @ p["wq1"] + p["bq1"])
    vector_out = (hv @ p["wq2"] + p["bq2"]).reshape(B, V, 3)
    return scalar_out, vector_out


if __name__ == "__main__":
    # TODO(synk): the scalar-only / vector-only / (None, None) branches of the
    # PyTorch forward are not exercised; both inputs are assumed present.
    B, N = 2, 8
    scalar_dim, vector_dim = 16, 8

    key = jax.random.PRNGKey(0)
    k_s, k_v, k_p = jax.random.split(key, 3)
    scalar = jax.random.normal(k_s, (B, N, scalar_dim), jnp.float32)
    vector = jax.random.normal(k_v, (B, N, vector_dim, 3), jnp.float32)
    params = init_params(k_p, scalar_dim, vector_dim)

    w1_slab, w23_slab, b_slab = pack_params(params, scalar_dim, vector_dim)

    fwd = jax.jit(self_attention_forward)
    scalar_out, vector_out = fwd(scalar, vector, w1_slab, w23_slab, b_slab)
    jax.block_until_ready((scalar_out, vector_out))

    ref_s, ref_v = reference_forward(scalar, vector, params)
    assert scalar_out.shape == (B, scalar_dim)
    assert vector_out.shape == (B, vector_dim, 3)
    # Tolerance reflects bf16 activations/weights inside the kernel (f32
    # accumulation); the softmax denominator itself is exact.
    assert jnp.allclose(scalar_out, ref_s, rtol=3e-2, atol=3e-2)
    assert jnp.allclose(vector_out, ref_v, rtol=3e-2, atol=3e-2)

    print("KERNEL_OK")
</pallas_src>

<mosaic_0001>
module attributes {stable_mosaic.version = 11 : i64} {
  func.func @self_attention_kernel(%arg0: i32, %arg1: memref<64x40xbf16, #tpu.memory_space<vmem>>, %arg2: memref<40x256xbf16, #tpu.memory_space<vmem>>, %arg3: memref<128x256xbf16, #tpu.memory_space<vmem>>, %arg4: memref<8x256xf32, #tpu.memory_space<vmem>>, %arg5: memref<8x128xf32, #tpu.memory_space<vmem>>) attributes {dimension_semantics = [#tpu.dimension_semantics<parallel>], iteration_bounds = array<i64: 1>, scalar_prefetch = 0 : i64, scratch_operands = 0 : i64, tpu.core_type = #tpu.core_type<tc>, window_params = [{transform_indices = @transform_0, window_bounds = array<i64: 64, 40>}, {pipeline_mode = #tpu.pipeline_mode<synchronous>, transform_indices = @transform_1, window_bounds = array<i64: 40, 256>}, {pipeline_mode = #tpu.pipeline_mode<synchronous>, transform_indices = @transform_2, window_bounds = array<i64: 128, 256>}, {pipeline_mode = #tpu.pipeline_mode<synchronous>, transform_indices = @transform_3, window_bounds = array<i64: 8, 256>}, {transform_indices = @transform_4, window_bounds = array<i64: 8, 128>}]} {
    %c0 = arith.constant 0 : index
    %c0_0 = arith.constant 0 : index
    %0 = vector.load %arg1[%c0, %c0_0] : memref<64x40xbf16, #tpu.memory_space<vmem>>, vector<64x40xbf16>
    %c0_1 = arith.constant 0 : index
    %c0_2 = arith.constant 0 : index
    %1 = vector.load %arg2[%c0_1, %c0_2] : memref<40x256xbf16, #tpu.memory_space<vmem>>, vector<40x128xbf16>
    %cst = arith.constant dense<0.000000e+00> : vector<64x128xf32>
    %2 = tpu.matmul %0, %1, %cst {dimension_numbers = #tpu.dot_dimension_numbers<[1], [0], [0], [1], [0, 0, 1, 1], [], []>} : vector<64x40xbf16>, vector<40x128xbf16>, vector<64x128xf32> -> vector<64x128xf32>
    %c0_3 = arith.constant 0 : index
    %c0_4 = arith.constant 0 : index
    %3 = vector.load %arg4[%c0_3, %c0_4] : memref<8x256xf32, #tpu.memory_space<vmem>>, vector<1x128xf32>
    %4 = vector.broadcast %3 : vector<1x128xf32> to vector<64x128xf32>
    %5 = arith.addf %2, %4 : vector<64x128xf32>
    %6 = vector.shape_cast %5 : vector<64x128xf32> to vector<8x8x128xf32>
    %c0_5 = arith.constant 0 : index
    %c128 = arith.constant 128 : index
    %7 = vector.load %arg2[%c0_5, %c128] : memref<40x256xbf16, #tpu.memory_space<vmem>>, vector<40x128xbf16>
    %cst_6 = arith.constant dense<0.000000e+00> : vector<64x128xf32>
    %8 = tpu.matmul %0, %7, %cst_6 {dimension_numbers = #tpu.dot_dimension_numbers<[1], [0], [0], [1], [0, 0, 1, 1], [], []>} : vector<64x40xbf16>, vector<40x128xbf16>, vector<64x128xf32> -> vector<64x128xf32>
    %c0_7 = arith.constant 0 : index
    %c128_8 = arith.constant 128 : index
    %9 = vector.load %arg4[%c0_7, %c128_8] : memref<8x256xf32, #tpu.memory_space<vmem>>, vector<1x128xf32>
    %10 = vector.broadcast %9 : vector<1x128xf32> to vector<64x128xf32>
    %11 = arith.addf %8, %10 : vector<64x128xf32>
    %12 = vector.shape_cast %11 : vector<64x128xf32> to vector<8x8x128xf32>
    %cst_9 = arith.constant dense<0xFF800000> : vector<8x128xf32>
    %13 = vector.multi_reduction <maximumf>, %6, %cst_9 [1] : vector<8x8x128xf32> to vector<8x128xf32>
    %14 = vector.shape_cast %13 : vector<8x128xf32> to vector<8x1x128xf32>
    %15 = vector.broadcast %14 : vector<8x1x128xf32> to vector<8x8x128xf32>
    %16 = arith.subf %6, %15 : vector<8x8x128xf32>
    %17 = math.exp %16 : vector<8x8x128xf32>
    %cst_10 = arith.constant dense<0.000000e+00> : vector<8x128xf32>
    %18 = vector.multi_reduction <add>, %17, %cst_10 [1] : vector<8x8x128xf32> to vector<8x128xf32>
    %19 = arith.mulf %17, %12 : vector<8x8x128xf32>
    %cst_11 = arith.constant dense<0.000000e+00> : vector<8x128xf32>
    %20 = vector.multi_reduction <add>, %19, %cst_11 [1] : vector<8x8x128xf32> to vector<8x128xf32>
    %21 = arith.divf %20, %18 : vector<8x128xf32>
    %22 = arith.truncf %21 : vector<8x128xf32> to vector<8x128xbf16>
    %c0_12 = arith.constant 0 : index
    %c0_13 = arith.constant 0 : index
    %23 = vector.load %arg3[%c0_12, %c0_13] : memref<128x256xbf16, #tpu.memory_space<vmem>>, vector<128x128xbf16>
    %cst_14 = arith.constant dense<0.000000e+00> : vector<8x128xf32>
    %24 = tpu.matmul %22, %23, %cst_14 {dimension_numbers = #tpu.dot_dimension_numbers<[1], [0], [0], [1], [0, 0, 1, 1], [], []>} : vector<8x128xbf16>, vector<128x128xbf16>, vector<8x128xf32> -> vector<8x128xf32>
    %c1 = arith.constant 1 : index
    %c0_15 = arith.constant 0 : index
    %25 = vector.load %arg4[%c1, %c0_15] : memref<8x256xf32, #tpu.memory_space<vmem>>, vector<1x128xf32>
    %26 = vector.broadcast %25 : vector<1x128xf32> to vector<8x128xf32>
    %27 = arith.addf %24, %26 : vector<8x128xf32>
    %28 = arith.negf %27 : vector<8x128xf32>
    %29 = math.exp %28 : vector<8x128xf32>
    %cst_16 = arith.constant 1.000000e+00 : f32
    %30 = vector.broadcast %cst_16 : f32 to vector<8x128xf32>
    %31 = arith.addf %30, %29 : vector<8x128xf32>
    %32 = arith.divf %30, %31 : vector<8x128xf32>
    %33 = arith.mulf %27, %32 : vector<8x128xf32>
    %34 = arith.truncf %33 : vector<8x128xf32> to vector<8x128xbf16>
    %c0_17 = arith.constant 0 : index
    %c128_18 = arith.constant 128 : index
    %35 = vector.load %arg3[%c0_17, %c128_18] : memref<128x256xbf16, #tpu.memory_space<vmem>>, vector<128x128xbf16>
    %cst_19 = arith.constant dense<0.000000e+00> : vector<8x128xf32>
    %36 = tpu.matmul %34, %35, %cst_19 {dimension_numbers = #tpu.dot_dimension_numbers<[1], [0], [0], [1], [0, 0, 1, 1], [], []>} : vector<8x128xbf16>, vector<128x128xbf16>, vector<8x128xf32> -> vector<8x128xf32>
    %c2 = arith.constant 2 : index
    %c0_20 = arith.constant 0 : index
    %37 = vector.load %arg4[%c2, %c0_20] : memref<8x256xf32, #tpu.memory_space<vmem>>, vector<1x128xf32>
    %38 = vector.broadcast %37 : vector<1x128xf32> to vector<8x128xf32>
    %39 = arith.addf %36, %38 : vector<8x128xf32>
    %c0_21 = arith.constant 0 : index
    %c0_22 = arith.constant 0 : index
    %40 = vector.load %arg5[%c0_21, %c0_22] : memref<8x128xf32, #tpu.memory_space<vmem>>, vector<8x128xf32>
    tpu.vector_store %arg5[%c0_21, %c0_22], %39 {strides = array<i32>} : memref<8x128xf32, #tpu.memory_space<vmem>>, vector<8x128xf32>,
    return
  }
  func.func @transform_0(%arg0: i32) -> (i32, i32) {
    %c0_i32 = arith.constant 0 : i32
    %c0_i32_0 = arith.constant 0 : i32
    return %arg0, %c0_i32 : i32, i32
  }
  func.func @transform_1(%arg0: i32) -> (i32, i32) {
    %c0_i32 = arith.constant 0 : i32
    %c0_i32_0 = arith.constant 0 : i32
    %c0_i32_1 = arith.constant 0 : i32
    return %c0_i32, %c0_i32_0 : i32, i32
  }
  func.func @transform_2(%arg0: i32) -> (i32, i32) {
    %c0_i32 = arith.constant 0 : i32
    %c0_i32_0 = arith.constant 0 : i32
    %c0_i32_1 = arith.constant 0 : i32
    return %c0_i32, %c0_i32_0 : i32, i32
  }
  func.func @transform_3(%arg0: i32) -> (i32, i32) {
    %c0_i32 = arith.constant 0 : i32
    %c0_i32_0 = arith.constant 0 : i32
    %c0_i32_1 = arith.constant 0 : i32
    return %c0_i32, %c0_i32_0 : i32, i32
  }
  func.func @transform_4(%arg0: i32) -> (i32, i32) {
    %c0_i32 = arith.constant 0 : i32
    %c0_i32_0 = arith.constant 0 : i32
    return %arg0, %c0_i32 : i32, i32
  }
}

</mosaic_0001>

<bundles_post_ra>
// kernel: self_attention_forward.1
= control target key start
LH: loop header
LB: loop body
LE: loop exit
PB: predicated region body
PF: predicated region fallthrough
CT: control target
= control target key end

     0   :  { %vm67_vm0 = vcmask 326656   ;;  %vm80_vm1 = vcmask 1043456   ;;  %v894_v12 = vmov 0.0   ;;  %vm895_vm2 = vmmov 0   ;;  %s1093_s1 = inlined_call_operand.vmem [shape: bf16[40,256], index: 1, kind: input, shape index: {}]   ;;  %s1094_s0 = inlined_call_operand.vmem [shape: bf16[64,40], index: 0, kind: input, shape index: {}]   ;;  %s1095_s2 = inlined_call_operand.vmem [shape: bf16[128,256], index: 2, kind: input, shape index: {}]   ;;  %s1096_s3 = inlined_call_operand.vmem [shape: f32[8,256], index: 3, kind: input, shape index: {}]   ;;  %s1097_s4 = inlined_call_operand.vmem [shape: f32[8,128], index: 4, kind: output, shape index: {}]  }
   0x1   :  { %v832_v0 = vld [vmem:[%s1093_s1] ss:$8 sps:$4 sm:$0xff]   ;;  %v833_v1 = vld [vmem:[%s1093_s1 + $0x10] ss:$8 sps:$4 sm:$0xff]   ;;  %v839_v5 = vld [vmem:[%s1093_s1 + $0x4] ss:$8 sps:$4 sm:$0xff]  }
   0x2   :  { %760 = vmatprep.subr.bf16.mxu0 %v832_v0  ;;  %v834_v2 = vld [vmem:[%s1093_s1 + $0x20] ss:$0 sps:$4 sm:$0xff]   ;;  %v840_v6 = vld [vmem:[%s1093_s1 + $0x14] ss:$8 sps:$4 sm:$0xff]   ;;  %774 = vmatprep.subr.bf16.mxu1 %v839_v5  ;;  %v836_v7 = vld [vmem:[%s1094_s0 + $0x8] sm:$0xff]   ;;  %vm471_vm3 = vcmask 1041409  }
   0x3   :  { %761 = vmatpush3.bf16.msra.mxu0 %v832_v0  ;;  %v835_v3 = vld [vmem:[%s1094_s0] sm:$0xff]   ;;  %v82_v4 = vsel %vm80_vm1, %v834_v2, 0  ;;  %775 = vmatpush3.bf16.msra.mxu1 %v839_v5  ;;  %v837_v8 = vld [vmem:[%s1094_s0 + $0x10] sm:$0xff]   ;;  %v838_v11 = vld [vmem:[%s1094_s0 + $0x18] sm:$0xff]   ;;  %vm473_vm4 = vcmask 1042434   ;;  %vm475_vm5 = vcmask 1043459  }
   0x4   :  { %762 = vmatprep.subr.bf16.mxu0 %v833_v1  ;;  %766 = vmatprep.mubr.msk.bf16.mxu0 %vm67_vm0, %v835_v3  ;;  %v841_v9 = vld [vmem:[%s1093_s1 + $0x24] ss:$0 sps:$4 sm:$0xff]   ;;  %v842_v13 = vld [vmem:[%s1095_s2] ss:$8 sps:$4 sm:$0xff]   ;;  %v843_v14 = vld [vmem:[%s1095_s2 + $0x10] ss:$8 sps:$4 sm:$0xff]  }
   0x5   :  { %780 = vmatprep.mubr.msk.bf16.mxu1 %vm67_vm0, %v835_v3  ;;  %776 = vmatprep.subr.bf16.mxu1 %v840_v6  ;;  %v171_v10 = vsel %vm80_vm1, %v841_v9, 0  ;;  %v844_v15 = vld [vmem:[%s1095_s2 + $0x20] ss:$8 sps:$4 sm:$0xff]   ;;  %v845_v16 = vld [vmem:[%s1095_s2 + $0x30] ss:$8 sps:$4 sm:$0xff]   ;;  %vm477_vm6 = vcmask 1044484  }
   0x6   :  { %v846_v17 = vld [vmem:[%s1095_s2 + $0x40] ss:$8 sps:$4 sm:$0xff]   ;;  %v847_v18 = vld [vmem:[%s1095_s2 + $0x50] ss:$8 sps:$4 sm:$0xff]   ;;  %vm479_vm7 = vcmask 1045509   ;;  %vm481_vm8 = vcmask 1046534  }
   0x7   :  { %763 = vmatpush3.bf16.msra.mxu0 %v833_v1  ;;  %777 = vmatpush3.bf16.msra.mxu1 %v840_v6  ;;  %v848_v19 = vld [vmem:[%s1095_s2 + $0x60] ss:$8 sps:$4 sm:$0xff]   ;;  %v849_v20 = vld [vmem:[%s1095_s2 + $0x70] ss:$8 sps:$4 sm:$0xff]   ;;  %vm483_vm9 = vcmask 1047559  }
   0x8   :  { %828 = vmatprep.subr.msk.bf16.mxu0 %vm80_vm1, %v834_v2  ;;  %829 = vmatprep.subr.msk.bf16.mxu1 %vm80_vm1, %v841_v9  ;;  %v31_v21 = vld [vmem:[%s1096_s3] ss:$0 sm:$0xff] }
   0xb   :  { %765 = vmatpush3.bf16.msra.mxu0 %v82_v4  ;;  %779 = vmatpush3.bf16.msra.mxu1 %v171_v10 }
   0xc   :  { %788 = vmatprep.subr.bf16.mxu0 %v894_v12  ;;  %808 = vmatprep.subr.bf16.mxu1 %v894_v12 }
   0xe   :  { %767 = vmatmul.mubr.msk.bf16.vlgmr.msra.gmra.mrb[0].mxu0 %vm67_vm0, %v836_v7  ;;  %781 = vmatmul.mubr.msk.bf16.vlgmr.msra.gmra.mrb[0].mxu1 %vm67_vm0, %v836_v7 }
   0xf   :  { %770 = vmatprep.mubr.msk.bf16.mxu0 %vm67_vm0, %v837_v8  ;;  %784 = vmatprep.mubr.msk.bf16.mxu1 %vm67_vm0, %v837_v8 }
  0x10   :  { %789 = vmatpush3.bf16.msra.mxu0 %v842_v13 }
  0x11   :  { %790 = vmatprep.subr.bf16.mxu0 %v894_v12 }
  0x14   :  { %791 = vmatpush3.bf16.msra.mxu0 %v843_v14 }
  0x15   :  { %792 = vmatprep.subr.bf16.mxu0 %v894_v12 }
  0x16   :  { %771 = vmatmul.mubr.msk.bf16.gmra.mrb[4].mxu0 %vm67_vm0, %v838_v11  ;;  %785 = vmatmul.mubr.msk.bf16.gmra.mrb[4].mxu1 %vm67_vm0, %v838_v11 }
  0x17   :  { %804 = vmatprep.mubr.msk.bf16.mxu0 %vm895_vm2, %v894_v12  ;;  %824 = vmatprep.mubr.msk.bf16.mxu1 %vm895_vm2, %v894_v12 }
  0x18   :  { %793 = vmatpush3.bf16.msra.mxu0 %v844_v15 }
  0x19   :  { %794 = vmatprep.subr.bf16.mxu0 %v894_v12 }
  0x1c   :  { %795 = vmatpush3.bf16.msra.mxu0 %v845_v16 }
  0x1d   :  { %796 = vmatprep.subr.bf16.mxu0 %v894_v12 }
  0x20   :  { %797 = vmatpush3.bf16.msra.mxu0 %v846_v17 }
  0x21   :  { %798 = vmatprep.subr.bf16.mxu0 %v894_v12 }
  0x24   :  { %799 = vmatpush3.bf16.msra.mxu0 %v847_v18 }
  0x25   :  { %800 = vmatprep.subr.bf16.mxu0 %v894_v12 }
  0x28   :  { %801 = vmatpush3.bf16.msra.mxu0 %v848_v19 }
  0x29   :  { %802 = vmatprep.subr.bf16.mxu0 %v894_v12 }
  0x2c   :  { %803 = vmatpush3.bf16.msra.mxu0 %v849_v20 }
  0xe1   :  { %v768_v22 = vpop.f32.mrb[0].mxu0  ;;  %v1008_v38 = vpop.f32.mrb[0].mxu1 }
  0xe2   :  { %v127_v23 = vadd.f32 %v768_v22, %v31_v21  ;;  %v118_v24 = vpop.f32.mrb[1].mxu0  ;;  %v1011_v42 = vpop.f32.mrb[1].mxu1 }
  0xe3   :  { %v119_v25 = vadd.f32 %v118_v24, %v31_v21  ;;  %v769_v26 = vpop.f32.mrb[2].mxu0  ;;  %v1015_v47 = vpop.f32.mrb[2].mxu1 }
  0xe4   :  { %v250_v27 = vrot.slane %v127_v23, 4  ;;  %v1001_v28 = vadd.f32 %v769_v26, %v31_v21  ;;  %v121_v29 = vpop.f32.mrb[3].mxu0  ;;  %v1017_v52 = vpop.f32.mrb[3].mxu1 }
  0xe5   :  { %v238_v30 = vrot.slane %v119_v25, 4  ;;  %v1003_v31 = vadd.f32 %v121_v29, %v31_v21 }
  0xe6   :  { %v251_v32 = vmax.f32 %v127_v23, %v250_v27  ;;  %v256_v33 = vrot.slane %v1001_v28, 4 }
  0xe7   :  { %v239_v34 = vmax.f32 %v119_v25, %v238_v30  ;;  %v244_v35 = vrot.slane %v1003_v31, 4 }
  0xe8   :  { %v252_v36 = vrot.slane %v251_v32, 2  ;;  %v257_v37 = vmax.f32 %v1001_v28, %v256_v33 }
  0xe9   :  { %v240_v39 = vrot.slane %v239_v34, 2  ;;  %v245_v40 = vmax.f32 %v1003_v31, %v244_v35  ;;  %v772_v41 = vpop.f32.mrb[4].mxu0  ;;  %v1021_v10 = vpop.f32.mrb[4].mxu1 }
  0xea   :  { %v253_v43 = vmax.f32 %v251_v32, %v252_v36  ;;  %v258_v44 = vrot.slane %v257_v37, 2  ;;  %v1013_v45 = vadd.f32 %v772_v41, %v31_v21  ;;  %v134_v46 = vpop.f32.mrb[5].mxu0  ;;  %v1023_v16 = vpop.f32.mrb[5].mxu1 }
  0xeb   :  { %v241_v48 = vmax.f32 %v239_v34, %v240_v39  ;;  %v246_v49 = vrot.slane %v245_v40, 2  ;;  %v135_v50 = vadd.f32 %v134_v46, %v31_v21  ;;  %v773_v51 = vpop.f32.mrb[6].mxu0 }
  0xec   :  { %v254_v53 = vrot.slane %v253_v43, 1  ;;  %v259_v54 = vmax.f32 %v257_v37, %v258_v44  ;;  %v274_v55 = vrot.slane %v1013_v45, 4  ;;  %v146_v56 = vadd.f32 %v773_v51, %v31_v21  ;;  %v137_v57 = vpop.f32.mrb[7].mxu0 }
  0xed   :  { %v242_v58 = vrot.slane %v241_v48, 1  ;;  %v247_v59 = vmax.f32 %v245_v40, %v246_v49  ;;  %v262_v60 = vrot.slane %v135_v50, 4  ;;  %v138_v61 = vadd.f32 %v137_v57, %v31_v21  ;;  %v1026_v21 = vpop.f32.mrb[6].mxu1  ;;  %v1035_v40 = vld [vmem:[%s1096_s3 + $0x8] ss:$0 sm:$0xff] }
  0xee   :  { %v255_v62 = vmax.f32 %v253_v43, %v254_v53  ;;  %v260_v63 = vrot.slane %v259_v54, 1  ;;  %v275_v0 = vmax.f32 %v1013_v45, %v274_v55  ;;  %v280_v1 = vrot.slane %v146_v56, 4  ;;  %v1029_v27 = vpop.f32.mrb[7].mxu1 }
  0xef   :  { %v243_v2 = vmax.f32 %v241_v48, %v242_v58  ;;  %v248_v3 = vrot.slane %v247_v59, 1  ;;  %v263_v4 = vmax.f32 %v135_v50, %v262_v60  ;;  %v268_v5 = vrot.slane %v138_v61, 4 }
  0xf0   :  { %v288_v6 = vsub.f32 %v127_v23, %v255_v62  ;;  %v261_v7 = vmax.f32 %v259_v54, %v260_v63  ;;  %v276_v8 = vrot.slane %v275_v0, 2  ;;  %v281_v9 = vmax.f32 %v146_v56, %v280_v1 }
  0xf1   :  { %v286_v11 = vsub.f32 %v119_v25, %v243_v2  ;;  %v249_v13 = vmax.f32 %v247_v59, %v248_v3  ;;  %v264_v14 = vrot.slane %v263_v4, 2  ;;  %v269_v15 = vmax.f32 %v138_v61, %v268_v5 }
  0xf2   :  { %v298_v17 = vmul.f32 1.442695, %v288_v6  ;;  %v289_v18 = vsub.f32 %v1001_v28, %v261_v7  ;;  %v277_v19 = vmax.f32 %v275_v0, %v276_v8  ;;  %v282_v20 = vrot.slane %v281_v9, 2 }
  0xf3   :  { %v294_v22 = vmul.f32 1.442695, %v286_v11  ;;  %v287_v23 = vsub.f32 %v1003_v31, %v249_v13  ;;  %v265_v24 = vmax.f32 %v263_v4, %v264_v14  ;;  %v270_v26 = vrot.slane %v269_v15, 2 }
  0xf4   :  { %858 = vpow2.f32 %v298_v17  ;;  %v300_v25 = vmul.f32 1.442695, %v289_v18  ;;  %v278_v29 = vrot.slane %v277_v19, 1  ;;  %v283_v30 = vmax.f32 %v281_v9, %v282_v20 }
  0xf5   :  { %860 = vpow2.f32 %v294_v22  ;;  %v296_v32 = vmul.f32 1.442695, %v287_v23  ;;  %v266_v33 = vrot.slane %v265_v24, 1  ;;  %v271_v34 = vmax.f32 %v269_v15, %v270_v26 }
  0xf6   :  { %862 = vpow2.f32 %v300_v25  ;;  %v279_v28 = vmax.f32 %v277_v19, %v278_v29  ;;  %v284_v35 = vrot.slane %v283_v30, 1  ;;  %v216_v51 = vadd.f32 %v1008_v38, %v1035_v40 }
  0xf7   :  { %864 = vpow2.f32 %v296_v32  ;;  %v267_v36 = vmax.f32 %v265_v24, %v266_v33  ;;  %v272_v37 = vrot.slane %v271_v34, 1  ;;  %v208_v54 = vadd.f32 %v1011_v42, %v1035_v40 }
  0xf8   :  { %v292_v31 = vsub.f32 %v1013_v45, %v279_v28  ;;  %v285_v39 = vmax.f32 %v283_v30, %v284_v35  ;;  %v219_v55 = vadd.f32 %v1015_v47, %v1035_v40 }
  0xf9   :  { %v290_v41 = vsub.f32 %v135_v50, %v267_v36  ;;  %v273_v43 = vmax.f32 %v271_v34, %v272_v37  ;;  %v211_v50 = vadd.f32 %v1017_v52, %v1035_v40 }
  0xfa   :  { %v306_v44 = vmul.f32 1.442695, %v292_v31  ;;  %v293_v46 = vsub.f32 %v146_v56, %v285_v39  ;;  %v232_v39 = vadd.f32 %v1021_v10, %v1035_v40 }
  0xfb   :  { %v302_v48 = vmul.f32 1.442695, %v290_v41  ;;  %v291_v49 = vsub.f32 %v138_v61, %v273_v43 }
  0xfc   :  { %v308_v53 = vmul.f32 1.442695, %v293_v46  ;;  %866 = vpow2.f32 %v306_v44 }
  0xfd   :  { %v304_v45 = vmul.f32 1.442695, %v291_v49  ;;  %868 = vpow2.f32 %v302_v48  ;;  %v224_v48 = vadd.f32 %v1023_v16, %v1035_v40 }
  0xfe   :  { %v859_v57 = vpop.eup %858  ;;  %870 = vpow2.f32 %v308_v53  ;;  %v227_v53 = vadd.f32 %v1029_v27, %v1035_v40 }
  0xff   :  { %v861_v56 = vpop.eup %860  ;;  %v322_v58 = vrot.slane %v859_v57, 4  ;;  %v360_v59 = vmul.f32 %v859_v57, %v216_v51  ;;  %872 = vpow2.f32 %v304_v45  ;;  %v235_v51 = vadd.f32 %v1026_v21, %v1035_v40 }
 0x100   :  { %v863_v60 = vpop.eup %862  ;;  %v310_v38 = vrot.slane %v861_v56, 4  ;;  %v358_v61 = vmul.f32 %v861_v56, %v208_v54 }
 0x101   :  { %v865_v62 = vpop.eup %864  ;;  %v323_v42 = vadd.f32 %v859_v57, %v322_v58  ;;  %v378_v63 = vrot.slane %v360_v59, 4  ;;  %v328_v0 = vrot.slane %v863_v60, 4  ;;  %v361_v1 = vmul.f32 %v863_v60, %v219_v55 }
 0x102   :  { %v311_v2 = vadd.f32 %v861_v56, %v310_v38  ;;  %v366_v47 = vrot.slane %v358_v61, 4  ;;  %v316_v3 = vrot.slane %v865_v62, 4  ;;  %v359_v4 = vmul.f32 %v865_v62, %v211_v50 }
 0x103   :  { %v324_v5 = vrot.slane %v323_v42, 2  ;;  %v379_v6 = vadd.f32 %v378_v63, %v360_v59  ;;  %v329_v52 = vadd.f32 %v863_v60, %v328_v0  ;;  %v384_v7 = vrot.slane %v361_v1, 4 }
 0x104   :  { %v312_v8 = vrot.slane %v311_v2, 2  ;;  %v367_v9 = vadd.f32 %v366_v47, %v358_v61  ;;  %v317_v11 = vadd.f32 %v865_v62, %v316_v3  ;;  %v372_v13 = vrot.slane %v359_v4, 4 }
 0x105   :  { %v325_v14 = vadd.f32 %v324_v5, %v323_v42  ;;  %v380_v15 = vrot.slane %v379_v6, 2  ;;  %v330_v17 = vrot.slane %v329_v52, 2  ;;  %v385_v18 = vadd.f32 %v384_v7, %v361_v1 }
 0x106   :  { %v313_v19 = vadd.f32 %v312_v8, %v311_v2  ;;  %v368_v20 = vrot.slane %v367_v9, 2  ;;  %v318_v22 = vrot.slane %v317_v11, 2  ;;  %v373_v23 = vadd.f32 %v372_v13, %v359_v4  ;;  %v867_v24 = vpop.eup %866 }
 0x107   :  { %v326_v26 = vrot.slane %v325_v14, 1  ;;  %v331_v25 = vadd.f32 %v330_v17, %v329_v52  ;;  %v386_v29 = vrot.slane %v385_v18, 2  ;;  %v869_v30 = vpop.eup %868  ;;  %v381_v32 = vadd.f32 %v380_v15, %v379_v6 }
 0x108   :  { %v314_v33 = vrot.slane %v313_v19, 1  ;;  %v369_v34 = vadd.f32 %v368_v20, %v367_v9  ;;  %v319_v28 = vadd.f32 %v318_v22, %v317_v11  ;;  %v871_v35 = vpop.eup %870  ;;  %v374_v31 = vrot.slane %v373_v23, 2 }
 0x109   :  { %v327_v36 = vadd.f32 %v326_v26, %v325_v14  ;;  %v332_v37 = vrot.slane %v331_v25, 1  ;;  %v873_v41 = vpop.eup %872  ;;  %v387_v44 = vadd.f32 %v386_v29, %v385_v18  ;;  %v382_v54 = vrot.slane %v381_v32, 1 }
 0x10a   :  { %v315_v43 = vadd.f32 %v314_v33, %v313_v19  ;;  %v320_v46 = vrot.slane %v319_v28, 1  ;;  %v370_v45 = vrot.slane %v369_v34, 1  ;;  %v375_v10 = vadd.f32 %v374_v31, %v373_v23 }
 0x10b   :  { %874 = vrcp.f32 %v327_v36  ;;  %v333_v49 = vadd.f32 %v332_v37, %v331_v25  ;;  %v346_v57 = vrot.slane %v867_v24, 4  ;;  %v364_v50 = vmul.f32 %v867_v24, %v232_v39 }
 0x10c   :  { %876 = vrcp.f32 %v315_v43  ;;  %v321_v55 = vadd.f32 %v320_v46, %v319_v28  ;;  %v388_v56 = vrot.slane %v387_v44, 1  ;;  %v334_v58 = vrot.slane %v869_v30, 4 }
 0x10d   :  { %878 = vrcp.f32 %v333_v49  ;;  %v362_v16 = vmul.f32 %v869_v30, %v224_v48  ;;  %v347_v59 = vadd.f32 %v867_v24, %v346_v57  ;;  %v402_v60 = vrot.slane %v364_v50, 4 }
 0x10e   :  { %880 = vrcp.f32 %v321_v55  ;;  %v352_v38 = vrot.slane %v871_v35, 4  ;;  %v365_v61 = vmul.f32 %v871_v35, %v235_v51  ;;  %v335_v21 = vadd.f32 %v869_v30, %v334_v58 }
 0x10f   :  { %v390_v62 = vrot.slane %v362_v16, 4  ;;  %v340_v42 = vrot.slane %v873_v41, 4  ;;  %v363_v27 = vmul.f32 %v873_v41, %v227_v53  ;;  %v376_v40 = vrot.slane %v375_v10, 1 }
 0x110   :  { %v348_v63 = vrot.slane %v347_v59, 2  ;;  %v353_v0 = vadd.f32 %v871_v35, %v352_v38  ;;  %v403_v1 = vadd.f32 %v402_v60, %v364_v50  ;;  %v336_v2 = vrot.slane %v335_v21, 2 }
 0x111   :  { %v408_v47 = vrot.slane %v365_v61, 4  ;;  %v341_v3 = vadd.f32 %v873_v41, %v340_v42  ;;  %v383_v4 = vadd.f32 %v382_v54, %v381_v32  ;;  %v391_v6 = vadd.f32 %v390_v62, %v362_v16 }
 0x112   :  { %v349_v5 = vadd.f32 %v348_v63, %v347_v59  ;;  %v354_v52 = vrot.slane %v353_v0, 2  ;;  %v371_v7 = vadd.f32 %v370_v45, %v369_v34  ;;  %v389_v8 = vadd.f32 %v388_v56, %v387_v44 }
 0x113   :  { %v337_v9 = vadd.f32 %v336_v2, %v335_v21  ;;  %v342_v11 = vrot.slane %v341_v3, 2  ;;  %v377_v14 = vadd.f32 %v376_v40, %v375_v10  ;;  %v396_v18 = vrot.slane %v363_v27, 4 }
 0x114   :  { %v350_v15 = vrot.slane %v349_v5, 1  ;;  %v355_v17 = vadd.f32 %v354_v52, %v353_v0  ;;  %v404_v22 = vrot.slane %v403_v1, 2  ;;  %v409_v24 = vadd.f32 %v408_v47, %v365_v61 }
 0x115   :  { %v875_v13 = vpop.eup %874  ;;  %v338_v23 = vrot.slane %v337_v9, 1  ;;  %v392_v30 = vrot.slane %v391_v6, 2  ;;  %v343_v35 = vadd.f32 %v342_v11, %v341_v3  ;;  %v397_v31 = vadd.f32 %v396_v18, %v363_v27 }
 0x116   :  { %v877_v19 = vpop.eup %876  ;;  %v419_v20 = vmul.f32 %v875_v13, %v383_v4  ;;  %v351_v29 = vadd.f32 %v350_v15, %v349_v5  ;;  %v356_v32 = vrot.slane %v355_v17, 1  ;;  %v405_v41 = vadd.f32 %v404_v22, %v403_v1  ;;  %v850_v22 = vld [vmem:[%s1095_s2 + $0x4] ss:$8 sps:$4 sm:$0xff]  }
 0x117   :  { %v879_v26 = vpop.eup %878  ;;  %v415_v25 = vmul.f32 %v877_v19, %v371_v7  ;;  %v339_v28 = vadd.f32 %v338_v23, %v337_v9  ;;  %v410_v43 = vrot.slane %v409_v24, 2  ;;  %v393_v48 = vadd.f32 %v392_v30, %v391_v6  ;;  %809 = vmatpush3.bf16.msra.mxu1 %v850_v22  ;;  %v851_v23 = vld [vmem:[%s1095_s2 + $0x14] ss:$8 sps:$4 sm:$0xff]   ;;  %v856_v30 = vld [vmem:[%s1095_s2 + $0x64] ss:$8 sps:$4 sm:$0xff]  }
 0x118   :  { %v881_v33 = vpop.eup %880  ;;  %v421_v34 = vmul.f32 %v879_v26, %v389_v8  ;;  %882 = vrcp.f32 %v351_v29  ;;  %v432_v39 = vpack.c.bf16 %v419_v20, %v419_v20  ;;  %v357_v49 = vadd.f32 %v356_v32, %v355_v17  ;;  %810 = vmatprep.subr.bf16.mxu1 %v894_v12  ;;  %v853_v26 = vld [vmem:[%s1095_s2 + $0x34] ss:$8 sps:$4 sm:$0xff]  }
 0x119   :  { %v430_v36 = vpack.c.bf16 %v415_v25, %v415_v25  ;;  %v417_v37 = vmul.f32 %v881_v33, %v377_v14  ;;  %884 = vrcp.f32 %v339_v28  ;;  %v344_v51 = vrot.slane %v343_v35, 1  ;;  %v854_v25 = vld [vmem:[%s1095_s2 + $0x44] ss:$8 sps:$4 sm:$0xff]   ;;  %v855_v29 = vld [vmem:[%s1095_s2 + $0x54] ss:$8 sps:$4 sm:$0xff]  }
 0x11a   :  { %v433_v44 = vpack.c.bf16 %v421_v34, %v421_v34  ;;  %886 = vrcp.f32 %v357_v49  ;;  %v398_v45 = vrot.slane %v397_v31, 2  ;;  %v465_v55 = vunpack.c.l.b16 %v432_v39  ;;  %v857_v32 = vld [vmem:[%s1095_s2 + $0x74] ss:$8 sps:$4 sm:$0xff]   ;;  %v454_v33 = vld [vmem:[%s1096_s3 + $0x1] ss:$0 sm:$0xff] }
 0x11b   :  { %v431_v46 = vpack.c.bf16 %v417_v37, %v417_v37  ;;  %v463_v53 = vunpack.c.l.b16 %v430_v36  ;;  %v406_v10 = vrot.slane %v405_v41, 1  ;;  %v411_v57 = vadd.f32 %v410_v43, %v409_v24  ;;  %811 = vmatpush3.bf16.msra.mxu1 %v851_v23  ;;  %v852_v24 = vld [vmem:[%s1095_s2 + $0x24] ss:$8 sps:$4 sm:$0xff]  }
 0x11c   :  { %v345_v50 = vadd.f32 %v344_v51, %v343_v35  ;;  %v466_v56 = vunpack.c.l.b16 %v433_v44  ;;  %v394_v16 = vrot.slane %v393_v48, 1  ;;  %v399_v38 = vadd.f32 %v398_v45, %v397_v31  ;;  %812 = vmatprep.subr.bf16.mxu1 %v894_v12 }
 0x11d   :  { %v464_v54 = vunpack.c.l.b16 %v431_v46  ;;  %v407_v61 = vadd.f32 %v406_v10, %v405_v41  ;;  %v412_v21 = vrot.slane %v411_v57, 1  ;;  %v599_v46 = vld [vmem:[%s1096_s3 + $0x2] ss:$0 sm:$0xff] }
 0x11e   :  { %888 = vrcp.f32 %v345_v50  ;;  %v395_v42 = vadd.f32 %v394_v16, %v393_v48  ;;  %v400_v0 = vrot.slane %v399_v38, 1 }
 0x11f   :  { %v472_v58 = vsel %vm471_vm3, %v464_v54, %v463_v53  ;;  %v413_v1 = vadd.f32 %v412_v21, %v411_v57  ;;  %813 = vmatpush3.bf16.msra.mxu1 %v852_v24 }
 0x120   :  { %v474_v59 = vsel %vm473_vm4, %v465_v55, %v472_v58  ;;  %v401_v5 = vadd.f32 %v400_v0, %v399_v38  ;;  %814 = vmatprep.subr.bf16.mxu1 %v894_v12 }
 0x121   :  { %v476_v60 = vsel %vm475_vm5, %v466_v56, %v474_v59 }
 0x122   :  { %v883_v62 = vpop.eup %882 }
 0x123   :  { %v885_v27 = vpop.eup %884  ;;  %v427_v40 = vmul.f32 %v883_v62, %v407_v61  ;;  %815 = vmatpush3.bf16.msra.mxu1 %v853_v26 }
 0x124   :  { %v423_v63 = vmul.f32 %v885_v27, %v395_v42  ;;  %v887_v2 = vpop.eup %886  ;;  %816 = vmatprep.subr.bf16.mxu1 %v894_v12 }
 0x125   :  { %v429_v3 = vmul.f32 %v887_v2, %v413_v1  ;;  %v436_v8 = vpack.c.bf16 %v427_v40, %v427_v40 }
 0x126   :  { %v434_v47 = vpack.c.bf16 %v423_v63, %v423_v63 }
 0x127   :  { %v437_v9 = vpack.c.bf16 %v429_v3, %v429_v3  ;;  %v469_v14 = vunpack.c.l.b16 %v436_v8  ;;  %817 = vmatpush3.bf16.msra.mxu1 %v854_v25 }
 0x128   :  { %v467_v4 = vunpack.c.l.b16 %v434_v47  ;;  %v889_v6 = vpop.eup %888  ;;  %818 = vmatprep.subr.bf16.mxu1 %v894_v12 }
 0x129   :  { %v425_v7 = vmul.f32 %v889_v6, %v401_v5  ;;  %v470_v15 = vunpack.c.l.b16 %v437_v9 }
 0x12a   :  { %v478_v52 = vsel %vm477_vm6, %v467_v4, %v476_v60 }
 0x12b   :  { %v435_v11 = vpack.c.bf16 %v425_v7, %v425_v7  ;;  %819 = vmatpush3.bf16.msra.mxu1 %v855_v29 }
 0x12c   :  { %820 = vmatprep.subr.bf16.mxu1 %v894_v12 }
 0x12d   :  { %v468_v13 = vunpack.c.l.b16 %v435_v11 }
 0x12f   :  { %v480_v17 = vsel %vm479_vm7, %v468_v13, %v478_v52  ;;  %821 = vmatpush3.bf16.msra.mxu1 %v856_v30 }
 0x130   :  { %v482_v18 = vsel %vm481_vm8, %v469_v14, %v480_v17  ;;  %822 = vmatprep.subr.bf16.mxu1 %v894_v12 }
 0x131   :  { %v484_v19 = vsel %vm483_vm9, %v470_v15, %v482_v18 }
 0x132   :  { %v485_v20 = vpack.c.b16 %v484_v19, %v484_v19 }
 0x133   :  { %823 = vmatpush3.bf16.msra.mxu1 %v857_v32 }
 0x134   :  { %805 = vmatmul.mubr.bf16.vlgmr.msra.gmra.mrb[8].mxu0 %v485_v20 }
 0x207   :  { %v569_v34 = vpop.f32.mrb[8].mxu0 }
 0x208   :  { %v570_v28 = vadd.f32 %v569_v34, %v454_v33  ;;  %v806_v35 = vpop.f32.mrb[9].mxu0 }
 0x209   :  { %v572_v36 = vpop.f32.mrb[10].mxu0 }
 0x20a   :  { %v719_v37 = vmul.f32 -1.442695, %v570_v28  ;;  %v807_v31 = vpop.f32.mrb[11].mxu0 }
 0x20c   :  { %890 = vpow2.f32 %v719_v37 }
 0x216   :  { %v891_v39 = vpop.eup %890 }
 0x217   :  { %v578_v41 = vadd.f32 1.0, %v891_v39 }
 0x219   :  { %892 = vrcp.f32 %v578_v41 }
 0x223   :  { %v893_v12 = vpop.eup %892 }
 0x224   :  { %v581_v43 = vmul.f32 %v893_v12, %v570_v28 }
 0x226   :  { %v582_v44 = vpack.c.bf16 %v581_v43, %v581_v43 }
 0x228   :  { %825 = vmatmul.mubr.bf16.vlgmr.msra.gmra.mrb[8].mxu1 %v582_v44 }
 0x2fb   :  { %v682_v48 = vpop.f32.mrb[8].mxu1 }
 0x2fc   :  { %v683_v49 = vadd.f32 %v682_v48, %v599_v46  ;;  %v826_v51 = vpop.f32.mrb[9].mxu1 }
 0x2fd   :  { %v685_v53 = vpop.f32.mrb[10].mxu1 }
 0x2fe   :  { %688 = vst [vmem:[%s1097_s4] sm:$0xff] %v683_v49  ;;  %v827_v54 = vpop.f32.mrb[11].mxu1 }

</bundles_post_ra>
